<compile_context>
chip_gen: v6e
topology: v6e:2x2x1
jax: 0.10.0
libtpu: 0.0.40
codegen_flags: <defaults>
</compile_context>

<pallas_src>
import jax
import jax.numpy as jnp
from jax.experimental import pallas as pl
from jax.experimental.pallas import tpu as pltpu


def _round_up(x, m):
    return (x + m - 1) // m * m


def _make_aggregator_kernel(n_layers):
    """First matmul consumes the lane-dense (rows, C*R) bf16 block (mean is folded
    into the bf16 weight); remaining layers are small f32 matmuls. Single
    lane-dense f32 store."""

    def kernel(x_ref, *refs):
        out_ref = refs[-1]
        wb = refs[:-1]                                     # w1', b1, w2, b2, ...

        # Layer 0: bf16 x bf16 -> f32 accumulate on the MXU (mean already folded in).
        h = jnp.dot(x_ref[...], wb[0][...], preferred_element_type=jnp.float32)
        h = h + wb[1][...]                                 # f32 bias add (VPU, f32)
        if n_layers > 1:
            h = jnp.maximum(h, 0.0)

        # Hidden / output layers: tiny f32 matmuls, f32 elementwise.
        for l in range(1, n_layers):
            w = wb[2 * l][...]
            b = wb[2 * l + 1][...]
            h = jnp.dot(h, w, preferred_element_type=jnp.float32) + b
            if l < n_layers - 1:
                h = jnp.maximum(h, 0.0)

        out_ref[...] = h.astype(out_ref.dtype)             # single lane-dense store

    return kernel


def aggregator_forward(representations, params, *, max_row_tile=1024,
                       vmem_budget_bytes=20 << 20):
    """representations: (B, C, R) f32; params: [(w, b), ...] of utils.MLP."""
    B, C, R = representations.shape
    n_layers = len(params)
    out_dim = params[-1][0].shape[1]
    assert out_dim == R, "Aggregator requires sizes[-1] == representation_dim (x.view)"

    # ---- Fold the context-set mean into the first weight matrix ----------------
    w1, b1 = params[0]
    K = C * R
    K_pad = _round_up(K, 128)
    w1_folded = jnp.tile(w1, (C, 1)) * (1.0 / C)           # (C*R, H1)

    # ---- Zero-pad every layer width to a multiple of 128 (lane-dense) ----------
    # Padding is zeros in both K and N directions of adjacent layers, and the
    # padded bias columns are zero, so ReLU keeps padded lanes exactly 0 and no
    # leakage reaches the real outputs (which are sliced [:, :R] at the end).
    layer_ws = [w1_folded] + [w for (w, _) in params[1:]]
    layer_bs = [b for (_, b) in params]
    padded_ws, padded_bs = [], []
    k_prev_pad = K_pad
    for li, (w, b) in enumerate(zip(layer_ws, layer_bs)):
        k_in, n = w.shape
        n_pad = _round_up(n, 128)
        w_p = jnp.pad(w, ((0, k_prev_pad - k_in), (0, n_pad - n)))
        b_p = jnp.pad(b, ((0, 0), (0, n_pad - n))).astype(jnp.float32)
        if li == 0:
            w_p = w_p.astype(jnp.bfloat16)                 # matches bf16 activations
        else:
            w_p = w_p.astype(jnp.float32)
        padded_ws.append(w_p)
        padded_bs.append(b_p)
        k_prev_pad = n_pad
    N_out_pad = padded_ws[-1].shape[1]

    # ---- Row tiling: VMEM-budgeted, >=2 grid steps when the batch allows -------
    weight_bytes = sum(int(a.size) * a.dtype.itemsize
                       for a in padded_ws + padded_bs)
    bytes_per_row = K_pad * 2 + N_out_pad * 4              # bf16 in + f32 out
    budget_rows = max(8, (vmem_budget_bytes - 2 * weight_bytes)
                      // (2 * bytes_per_row))              # double-buffered in/out
    row_tile = min(max_row_tile, budget_rows // 8 * 8)
    bu8 = _round_up(B, 8)
    row_tile = min(row_tile, bu8)
    if bu8 >= 16:                                          # keep both v7x TCs busy
        row_tile = min(row_tile, _round_up(bu8 // 2, 8))
    row_tile = max(row_tile, 8)
    B_pad = _round_up(B, row_tile)

    # ---- Lane-dense bf16 input slab: (B_pad, K_pad) -----------------------------
    x_flat = representations.reshape(B, K)
    x_flat = jnp.pad(x_flat, ((0, B_pad - B), (0, K_pad - K)))
    x_flat = x_flat.astype(jnp.bfloat16)

    in_specs = [pl.BlockSpec((row_tile, K_pad), lambda i: (i, 0))]
    flat_wb = []
    for w_p, b_p in zip(padded_ws, padded_bs):
        in_specs.append(pl.BlockSpec(w_p.shape, lambda i: (0, 0)))   # resident weight
        in_specs.append(pl.BlockSpec(b_p.shape, lambda i: (0, 0)))   # resident bias
        flat_wb.extend([w_p, b_p])

    flops = 2 * B_pad * sum(int(w.shape[0]) * int(w.shape[1]) for w in padded_ws)
    bytes_accessed = (int(x_flat.size) * 2 + weight_bytes + B_pad * N_out_pad * 4)

    out = pl.pallas_call(
        _make_aggregator_kernel(n_layers),
        out_shape=jax.ShapeDtypeStruct((B_pad, N_out_pad), jnp.float32),
        grid=(B_pad // row_tile,),
        in_specs=in_specs,
        out_specs=pl.BlockSpec((row_tile, N_out_pad), lambda i: (i, 0)),
        compiler_params=pltpu.CompilerParams(
            dimension_semantics=("parallel",),
            vmem_limit_bytes=32 << 20),
        cost_estimate=pl.CostEstimate(
            flops=flops, transcendentals=0, bytes_accessed=bytes_accessed),
    )(x_flat, *flat_wb)

    return out[:B, :R].reshape(-1, R)


def init_mlp_params(key, sizes):
    """Deterministic PyTorch-Linear-style init: U(-1/sqrt(fan_in), 1/sqrt(fan_in))."""
    params = []
    for i in range(len(sizes) - 1):
        key, kw, kb = jax.random.split(key, 3)
        fan_in = sizes[i]
        bound = 1.0 / jnp.sqrt(fan_in)
        w = jax.random.uniform(kw, (sizes[i], sizes[i + 1]), jnp.float32, -bound, bound)
        b = jax.random.uniform(kb, (1, sizes[i + 1]), jnp.float32, -bound, bound)
        params.append((w, b))
    return params


def aggregator_reference(representations, params):
    """Pure-JAX f32 reference of the same forward pass."""
    mean = jnp.mean(representations, axis=-2)
    h = mean
    n_layers = len(params)
    for l, (w, b) in enumerate(params):
        h = h @ w + b[0]
        if l < n_layers - 1:
            h = jnp.maximum(h, 0.0)
    return h.reshape(-1, params[-1][0].shape[1])


if __name__ == "__main__":
    # Small CNP-style shapes: task_batch=2, context_set_size=8, representation_dim=32.
    B, C, R, H = 2, 8, 32, 32
    sizes = [R, H, H, R]            # utils.MLP(sizes): R -> H -> H -> R

    key = jax.random.PRNGKey(0)
    k_x, k_p = jax.random.split(key, 2)
    representations = jax.random.normal(k_x, (B, C, R), jnp.float32)
    params = init_mlp_params(k_p, sizes)

    out = aggregator_forward(representations, params)
    jax.block_until_ready(out)

    out_ref = aggregator_reference(representations, params)
    assert out.shape == (B, R), out.shape
    # bf16 input / first-layer weights -> loosened tolerance vs the f32 reference.
    assert jnp.allclose(out, out_ref, atol=1e-2, rtol=1e-2), (
        float(jnp.max(jnp.abs(out - out_ref))))

    print("KERNEL_OK")
</pallas_src>

<mosaic_0001>
module attributes {stable_mosaic.version = 11 : i64} {
  func.func @kernel(%arg0: i32, %arg1: memref<8x256xbf16, #tpu.memory_space<vmem>>, %arg2: memref<256x128xbf16, #tpu.memory_space<vmem>>, %arg3: memref<1x128xf32, #tpu.memory_space<vmem>>, %arg4: memref<128x128xf32, #tpu.memory_space<vmem>>, %arg5: memref<1x128xf32, #tpu.memory_space<vmem>>, %arg6: memref<128x128xf32, #tpu.memory_space<vmem>>, %arg7: memref<1x128xf32, #tpu.memory_space<vmem>>, %arg8: memref<8x128xf32, #tpu.memory_space<vmem>>) attributes {dimension_semantics = [#tpu.dimension_semantics<parallel>], iteration_bounds = array<i64: 1>, scalar_prefetch = 0 : i64, scratch_operands = 0 : i64, tpu.core_type = #tpu.core_type<tc>, window_params = [{transform_indices = @transform_0, window_bounds = array<i64: 8, 256>}, {pipeline_mode = #tpu.pipeline_mode<synchronous>, transform_indices = @transform_1, window_bounds = array<i64: 256, 128>}, {pipeline_mode = #tpu.pipeline_mode<synchronous>, transform_indices = @transform_2, window_bounds = array<i64: 1, 128>}, {pipeline_mode = #tpu.pipeline_mode<synchronous>, transform_indices = @transform_3, window_bounds = array<i64: 128, 128>}, {pipeline_mode = #tpu.pipeline_mode<synchronous>, transform_indices = @transform_4, window_bounds = array<i64: 1, 128>}, {pipeline_mode = #tpu.pipeline_mode<synchronous>, transform_indices = @transform_5, window_bounds = array<i64: 128, 128>}, {pipeline_mode = #tpu.pipeline_mode<synchronous>, transform_indices = @transform_6, window_bounds = array<i64: 1, 128>}, {transform_indices = @transform_7, window_bounds = array<i64: 8, 128>}]} {
    %c0 = arith.constant 0 : index
    %c0_0 = arith.constant 0 : index
    %0 = vector.load %arg1[%c0, %c0_0] : memref<8x256xbf16, #tpu.memory_space<vmem>>, vector<8x256xbf16>
    %c0_1 = arith.constant 0 : index
    %c0_2 = arith.constant 0 : index
    %1 = vector.load %arg2[%c0_1, %c0_2] : memref<256x128xbf16, #tpu.memory_space<vmem>>, vector<256x128xbf16>
    %cst = arith.constant dense<0.000000e+00> : vector<8x128xf32>
    %2 = tpu.matmul %0, %1, %cst {dimension_numbers = #tpu.dot_dimension_numbers<[1], [0], [0], [1], [0, 0, 1, 1], [], []>} : vector<8x256xbf16>, vector<256x128xbf16>, vector<8x128xf32> -> vector<8x128xf32>
    %c0_3 = arith.constant 0 : index
    %c0_4 = arith.constant 0 : index
    %3 = vector.load %arg3[%c0_3, %c0_4] : memref<1x128xf32, #tpu.memory_space<vmem>>, vector<1x128xf32>
    %4 = vector.broadcast %3 : vector<1x128xf32> to vector<8x128xf32>
    %5 = arith.addf %2, %4 : vector<8x128xf32>
    %cst_5 = arith.constant 0.000000e+00 : f32
    %6 = vector.broadcast %cst_5 : f32 to vector<8x128xf32>
    %7 = arith.maximumf %5, %6 : vector<8x128xf32>
    %c0_6 = arith.constant 0 : index
    %c0_7 = arith.constant 0 : index
    %8 = vector.load %arg4[%c0_6, %c0_7] : memref<128x128xf32, #tpu.memory_space<vmem>>, vector<128x128xf32>
    %c0_8 = arith.constant 0 : index
    %c0_9 = arith.constant 0 : index
    %9 = vector.load %arg5[%c0_8, %c0_9] : memref<1x128xf32, #tpu.memory_space<vmem>>, vector<1x128xf32>
    %cst_10 = arith.constant dense<0.000000e+00> : vector<8x128xf32>
    %10 = tpu.matmul %7, %8, %cst_10 {dimension_numbers = #tpu.dot_dimension_numbers<[1], [0], [0], [1], [0, 0, 1, 1], [], []>} : vector<8x128xf32>, vector<128x128xf32>, vector<8x128xf32> -> vector<8x128xf32>
    %11 = vector.broadcast %9 : vector<1x128xf32> to vector<8x128xf32>
    %12 = arith.addf %10, %11 : vector<8x128xf32>
    %cst_11 = arith.constant 0.000000e+00 : f32
    %13 = vector.broadcast %cst_11 : f32 to vector<8x128xf32>
    %14 = arith.maximumf %12, %13 : vector<8x128xf32>
    %c0_12 = arith.constant 0 : index
    %c0_13 = arith.constant 0 : index
    %15 = vector.load %arg6[%c0_12, %c0_13] : memref<128x128xf32, #tpu.memory_space<vmem>>, vector<128x128xf32>
    %c0_14 = arith.constant 0 : index
    %c0_15 = arith.constant 0 : index
    %16 = vector.load %arg7[%c0_14, %c0_15] : memref<1x128xf32, #tpu.memory_space<vmem>>, vector<1x128xf32>
    %cst_16 = arith.constant dense<0.000000e+00> : vector<8x128xf32>
    %17 = tpu.matmul %14, %15, %cst_16 {dimension_numbers = #tpu.dot_dimension_numbers<[1], [0], [0], [1], [0, 0, 1, 1], [], []>} : vector<8x128xf32>, vector<128x128xf32>, vector<8x128xf32> -> vector<8x128xf32>
    %18 = vector.broadcast %16 : vector<1x128xf32> to vector<8x128xf32>
    %19 = arith.addf %17, %18 : vector<8x128xf32>
    %c0_17 = arith.constant 0 : index
    %c0_18 = arith.constant 0 : index
    %20 = vector.load %arg8[%c0_17, %c0_18] : memref<8x128xf32, #tpu.memory_space<vmem>>, vector<8x128xf32>
    tpu.vector_store %arg8[%c0_17, %c0_18], %19 {strides = array<i32>} : memref<8x128xf32, #tpu.memory_space<vmem>>, vector<8x128xf32>,
    return
  }
  func.func @transform_0(%arg0: i32) -> (i32, i32) {
    %c0_i32 = arith.constant 0 : i32
    %c0_i32_0 = arith.constant 0 : i32
    return %arg0, %c0_i32 : i32, i32
  }
  func.func @transform_1(%arg0: i32) -> (i32, i32) {
    %c0_i32 = arith.constant 0 : i32
    %c0_i32_0 = arith.constant 0 : i32
    %c0_i32_1 = arith.constant 0 : i32
    return %c0_i32, %c0_i32_0 : i32, i32
  }
  func.func @transform_2(%arg0: i32) -> (i32, i32) {
    %c0_i32 = arith.constant 0 : i32
    %c0_i32_0 = arith.constant 0 : i32
    %c0_i32_1 = arith.constant 0 : i32
    return %c0_i32, %c0_i32_0 : i32, i32
  }
  func.func @transform_3(%arg0: i32) -> (i32, i32) {
    %c0_i32 = arith.constant 0 : i32
    %c0_i32_0 = arith.constant 0 : i32
    %c0_i32_1 = arith.constant 0 : i32
    return %c0_i32, %c0_i32_0 : i32, i32
  }
  func.func @transform_4(%arg0: i32) -> (i32, i32) {
    %c0_i32 = arith.constant 0 : i32
    %c0_i32_0 = arith.constant 0 : i32
    %c0_i32_1 = arith.constant 0 : i32
    return %c0_i32, %c0_i32_0 : i32, i32
  }
  func.func @transform_5(%arg0: i32) -> (i32, i32) {
    %c0_i32 = arith.constant 0 : i32
    %c0_i32_0 = arith.constant 0 : i32
    %c0_i32_1 = arith.constant 0 : i32
    return %c0_i32, %c0_i32_0 : i32, i32
  }
  func.func @transform_6(%arg0: i32) -> (i32, i32) {
    %c0_i32 = arith.constant 0 : i32
    %c0_i32_0 = arith.constant 0 : i32
    %c0_i32_1 = arith.constant 0 : i32
    return %c0_i32, %c0_i32_0 : i32, i32
  }
  func.func @transform_7(%arg0: i32) -> (i32, i32) {
    %c0_i32 = arith.constant 0 : i32
    %c0_i32_0 = arith.constant 0 : i32
    return %arg0, %c0_i32 : i32, i32
  }
}

</mosaic_0001>

<bundles_post_ra>
// kernel: tpu_custom_call.1
= control target key start
LH: loop header
LB: loop body
LE: loop exit
PB: predicated region body
PF: predicated region fallthrough
CT: control target
= control target key end

     0   :  { %12 = vsyncpa [#allocation3], 0  ;;  %s863_s0 = inlined_call_operand.hbm [shape: bf16[8,256], index: 0, kind: input, shape index: {}]   ;;  %s864_s1 = inlined_call_operand.hbm [shape: bf16[256,128], index: 1, kind: input, shape index: {}]   ;;  %s865_s2 = inlined_call_operand.vmem [shape: f32[1,128], index: 2, kind: input, shape index: {}]   ;;  %s866_s3 = inlined_call_operand.hbm [shape: f32[128,128], index: 3, kind: input, shape index: {}]   ;;  %s867_s4 = inlined_call_operand.vmem [shape: f32[1,128], index: 4, kind: input, shape index: {}]   ;;  %s868_s5 = inlined_call_operand.hbm [shape: f32[128,128], index: 5, kind: input, shape index: {}]   ;;  %s869_s6 = inlined_call_operand.vmem [shape: f32[1,128], index: 6, kind: input, shape index: {}]   ;;  %s870_s7 = inlined_call_operand.hbm [shape: f32[8,128], index: 7, kind: output, shape index: {}]  }
   0x1   :  { %13 = vsyncpa [#allocation6], 0 }
   0x2   :  { %14 = vsyncpa [#allocation9], 0 }
   0x3   :  { %15 = vsyncpa [#allocation4], 0  ;;  %s754_s24 = smov [#allocation5]  }
   0x4   :  { %s31_s25 = sshll.u32 %s754_s24, 4  ;;  %s32_s25 = int_to_ptr.vmem [resolvable:$true] %s31_s25 }
   0x5   :  { %s654_s26 = scalar_lea.vmem %s32_s25, 2048  ;;  %p659_p1 = scmp.lt.s32.totalorder %s32_s25, %s32_s25 }
   0x6   :  { %p655_p0 = scmp.ne.s32.totalorder %s32_s25, %s654_s26  ;;  %p660_p2 = scmp.lt.s32.totalorder %s654_s26, %s654_s26 }
   0x8   :  { %p661_p3 = por %p660_p2, %p659_p1 }
   0xa   :  { %p662_p4 = pnand %p661_p3, %p655_p0 }
   0xc   :  { %665 = shalt.err (!%p662_p4)
}
   0xd   :  { %s755_s27 = smov 64   ;;  %s756_s28 = smov 4  }
   0xe   :  { %37 = dma.hbm_to_vmem [thread:$0]  %s864_s1, 2048, %s32_s25, [#allocation6], %s755_s27, %s755_s27, %s756_s28  }
   0xf   :  { %s757_s8 = smov [#allocation2]   ;;  %s758_s10 = smov [#allocation7]  }
  0x10   :  { %s22_s9 = sshll.u32 %s757_s8, 4  ;;  %s45_s11 = sshll.u32 %s758_s10, 4  ;;  %s23_s9 = int_to_ptr.vmem [resolvable:$true] %s22_s9  ;;  %s46_s11 = int_to_ptr.vmem [resolvable:$true] %s45_s11 }
  0x11   :  { %s674_s12 = scalar_lea.vmem %s23_s9, 128  ;;  %p679_p6 = scmp.lt.s32.totalorder %s23_s9, %s23_s9 }
  0x12   :  { %p675_p5 = scmp.ne.s32.totalorder %s23_s9, %s674_s12  ;;  %p680_p7 = scmp.lt.s32.totalorder %s674_s12, %s674_s12 }
  0x14   :  { %p681_p8 = por %p680_p7, %p679_p6 }
  0x16   :  { %p682_p9 = pnand %p681_p8, %p675_p5 }
  0x18   :  { %685 = shalt.err (!%p682_p9)
}
  0x19   :  { %25 = dma.hbm_to_vmem [thread:$0]  %s863_s0, 128, %s23_s9, [#allocation3]  }
  0x1a   :  { %s694_s15 = scalar_lea.vmem %s46_s11, 2048  ;;  %p699_p11 = scmp.lt.s32.totalorder %s46_s11, %s46_s11 }
  0x1b   :  { %p695_p10 = scmp.ne.s32.totalorder %s46_s11, %s694_s15  ;;  %p700_p12 = scmp.lt.s32.totalorder %s694_s15, %s694_s15 }
  0x1d   :  { %p701_p13 = por %p700_p12, %p699_p11 }
  0x1f   :  { %p702_p0 = pnand %p701_p13, %p695_p10 }
  0x21   :  { %705 = shalt.err (!%p702_p0)
}
  0x22   :  { %s759_s1 = smov 128   ;;  %s760_s16 = smov 8  }
  0x23   :  { %51 = dma.hbm_to_vmem [thread:$0]  %s866_s3, 2048, %s46_s11, [#allocation6], %s759_s1, %s759_s1, %s760_s16  }
  0x24   :  { %s761_s19 = smov [#allocation8]  }
  0x25   :  { %s59_s20 = sshll.u32 %s761_s19, 4  ;;  %s60_s20 = int_to_ptr.vmem [resolvable:$true] %s59_s20 }
  0x26   :  { %s714_s21 = scalar_lea.vmem %s60_s20, 2048  ;;  %p719_p2 = scmp.lt.s32.totalorder %s60_s20, %s60_s20 }
  0x27   :  { %p715_p1 = scmp.ne.s32.totalorder %s60_s20, %s714_s21  ;;  %p720_p3 = scmp.lt.s32.totalorder %s714_s21, %s714_s21 }
  0x29   :  { %p721_p4 = por %p720_p3, %p719_p2 }
  0x2b   :  { %p722_p5 = pnand %p721_p4, %p715_p1 }
  0x2d   :  { %725 = shalt.err (!%p722_p5)
}
  0x2e   :  { %65 = dma.hbm_to_vmem [thread:$0]  %s868_s5, 2048, %s60_s20, [#allocation9], %s759_s1, %s759_s1, %s760_s16  }
  0x2f   :  { %746 = dma.done.wait [#allocation3], 128  }
  0x30   :  { %747 = vsyncadd [#allocation3], 4294967168 }
  0x31   :  { %748 = dma.done.wait [#allocation6], 4096  }
  0x32   :  { %749 = vsyncadd [#allocation6], 4294963200 }
  0x33   :  { %750 = dma.done.wait [#allocation9], 2048  }
  0x34   :  { %751 = vsyncadd [#allocation9], 4294965248  ;;  %v762_v0 = vmov 0.0   ;;  %v628_v1 = vld [vmem:[#allocation5 + $0x78] sm:$0xff]   ;;  %v630_v3 = vld [vmem:[#allocation5 + $0x70] sm:$0xff]   ;;  %vm763_vm0 = vmmov 0  }
  0x35   :  { %547 = vmatprep.subr.mxu1 %v762_v0  ;;  %v629_v2 = vld [vmem:[#allocation5 + $0x38] sm:$0xff]   ;;  %491 = vmatprep.subr.bf16.mxu0 %v628_v1  ;;  %v631_v4 = vld [vmem:[#allocation5 + $0x30] sm:$0xff]   ;;  %v632_v5 = vld [vmem:[#allocation5 + $0x68] sm:$0xff]   ;;  %s764_s26 = smov [#allocation10]  }
  0x36   :  { %492 = vmatpush3.bf16.msra.mxu0 %v629_v2  ;;  %v633_v6 = vld [vmem:[#allocation5 + $0x28] sm:$0xff]   ;;  %v634_v7 = vld [vmem:[#allocation5 + $0x60] sm:$0xff]   ;;  %v636_v9 = vld [vmem:[#allocation5 + $0x58] sm:$0xff]   ;;  %579 = vmatprep.mubr.msk.f32.mxu1 %vm763_vm0, %v762_v0  ;;  %s459_s27 = sshll.u32 %s764_s26, 4  ;;  %s460_s27 = int_to_ptr.vmem [resolvable:$true] %s459_s27 }
  0x37   :  { %493 = vmatprep.subr.bf16.mxu0 %v630_v3  ;;  %v635_v8 = vld [vmem:[#allocation5 + $0x20] sm:$0xff]   ;;  %v637_v10 = vld [vmem:[#allocation5 + $0x18] sm:$0xff]   ;;  %v638_v11 = vld [vmem:[#allocation5 + $0x50] sm:$0xff]   ;;  %s726_s28 = scalar_lea.vmem %s460_s27, 128  ;;  %p731_p7 = scmp.lt.s32.totalorder %s460_s27, %s460_s27 }
  0x38   :  { %v81_v12 = vld [vmem:[#allocation2] sm:$0xff]  ;;  %v279_v15 = vld [vmem:[#allocation7 + $0x70] sm:$0xff]  ;;  %v278_v17 = vld [vmem:[#allocation7 + $0x68] sm:$0xff]  ;;  %p727_p6 = scmp.ne.s32.totalorder %s460_s27, %s726_s28  ;;  %p732_p8 = scmp.lt.s32.totalorder %s726_s28, %s726_s28 }
  0x39   :  { %v280_v13 = vld [vmem:[#allocation7 + $0x78] sm:$0xff]  ;;  %v472_v14 = vcombine.high %v81_v12, %v81_v12  ;;  %v639_v16 = vld [vmem:[#allocation5 + $0x10] sm:$0xff]   ;;  %v640_v18 = vld [vmem:[#allocation5 + $0x48] sm:$0xff]   ;;  %v471_v27 = vcombine.low %v81_v12, %v81_v12 }
  0x3a   :  { %494 = vmatpush3.bf16.msra.mxu0 %v631_v4  ;;  %548 = vmatpush3.msra.mxu1 %v280_v13  ;;  %v277_v19 = vld [vmem:[#allocation7 + $0x60] sm:$0xff]  ;;  %v641_v20 = vld [vmem:[#allocation5 + $0x8] sm:$0xff]   ;;  %v276_v21 = vld [vmem:[#allocation7 + $0x58] sm:$0xff]  ;;  %p733_p9 = por %p732_p8, %p731_p7 }
  0x3b   :  { %495 = vmatprep.subr.bf16.mxu0 %v632_v5  ;;  %549 = vmatprep.subr.mxu1 %v762_v0  ;;  %v642_v22 = vld [vmem:[#allocation5 + $0x40] sm:$0xff]   ;;  %v275_v23 = vld [vmem:[#allocation7 + $0x50] sm:$0xff]  ;;  %v274_v25 = vld [vmem:[#allocation7 + $0x48] sm:$0xff] }
  0x3c   :  { %256 = vmatprep.mubr.bf16.mxu0 %v472_v14  ;;  %550 = vmatpush3.msra.mxu1 %v279_v15  ;;  %v643_v24 = vld [vmem:[#allocation5] sm:$0xff]   ;;  %v272_v28 = vld [vmem:[#allocation7 + $0x38] sm:$0xff]  ;;  %v271_v29 = vld [vmem:[#allocation7 + $0x30] sm:$0xff]  ;;  %p734_p10 = pnand %p733_p9, %p727_p6 }
  0x3d   :  { %551 = vmatprep.subr.mxu1 %v762_v0  ;;  %v273_v26 = vld [vmem:[#allocation7 + $0x40] sm:$0xff]  ;;  %v270_v30 = vld [vmem:[#allocation7 + $0x28] sm:$0xff]  ;;  %v268_v32 = vld [vmem:[#allocation7 + $0x18] sm:$0xff] }
  0x3e   :  { %496 = vmatpush3.bf16.msra.mxu0 %v633_v6  ;;  %552 = vmatpush3.msra.mxu1 %v278_v17  ;;  %v269_v31 = vld [vmem:[#allocation7 + $0x20] sm:$0xff]  ;;  %v267_v33 = vld [vmem:[#allocation7 + $0x10] sm:$0xff]  ;;  %v266_v34 = vld [vmem:[#allocation7 + $0x8] sm:$0xff] }
  0x3f   :  { %497 = vmatprep.subr.bf16.mxu0 %v634_v7  ;;  %553 = vmatprep.subr.mxu1 %v762_v0  ;;  %v265_v35 = vld [vmem:[#allocation7] sm:$0xff]  ;;  %v374_v36 = vld [vmem:[#allocation8 + $0x78] sm:$0xff]  ;;  %v373_v37 = vld [vmem:[#allocation8 + $0x70] sm:$0xff] }
  0x40   :  { %554 = vmatpush3.msra.mxu1 %v277_v19  ;;  %v372_v38 = vld [vmem:[#allocation8 + $0x68] sm:$0xff]  ;;  %v371_v39 = vld [vmem:[#allocation8 + $0x60] sm:$0xff]  ;;  %v370_v40 = vld [vmem:[#allocation8 + $0x58] sm:$0xff] }
  0x41   :  { %555 = vmatprep.subr.mxu1 %v762_v0  ;;  %v369_v41 = vld [vmem:[#allocation8 + $0x50] sm:$0xff]  ;;  %v368_v42 = vld [vmem:[#allocation8 + $0x48] sm:$0xff]  ;;  %v367_v43 = vld [vmem:[#allocation8 + $0x40] sm:$0xff] }
  0x42   :  { %498 = vmatpush3.bf16.msra.mxu0 %v635_v8  ;;  %556 = vmatpush3.msra.mxu1 %v276_v21  ;;  %v366_v44 = vld [vmem:[#allocation8 + $0x38] sm:$0xff]  ;;  %v365_v45 = vld [vmem:[#allocation8 + $0x30] sm:$0xff]  ;;  %v364_v46 = vld [vmem:[#allocation8 + $0x28] sm:$0xff] }
  0x43   :  { %499 = vmatprep.subr.bf16.mxu0 %v636_v9  ;;  %557 = vmatprep.subr.mxu1 %v762_v0  ;;  %v363_v47 = vld [vmem:[#allocation8 + $0x20] sm:$0xff]  ;;  %v362_v48 = vld [vmem:[#allocation8 + $0x18] sm:$0xff]  ;;  %v361_v57 = vld [vmem:[#allocation8 + $0x10] sm:$0xff] }
  0x44   :  { %558 = vmatpush3.msra.mxu1 %v275_v23  ;;  %v470_v50 = vld [vmem:[%s865_s2] ss:$0 sm:$0xff]  ;;  %v360_v58 = vld [vmem:[#allocation8 + $0x8] sm:$0xff]  ;;  %v359_v59 = vld [vmem:[#allocation8] sm:$0xff] }
  0x45   :  { %559 = vmatprep.subr.mxu1 %v762_v0  ;;  %v489_v60 = vld [vmem:[%s867_s4] ss:$0 sm:$0xff] }
  0x46   :  { %500 = vmatpush3.bf16.msra.mxu0 %v637_v10  ;;  %560 = vmatpush3.msra.mxu1 %v274_v25  ;;  %v490_v2 = vld [vmem:[%s869_s6] ss:$0 sm:$0xff] }
  0x47   :  { %501 = vmatprep.subr.bf16.mxu0 %v638_v11  ;;  %561 = vmatprep.subr.mxu1 %v762_v0 }
  0x48   :  { %562 = vmatpush3.msra.mxu1 %v273_v26 }
  0x49   :  { %563 = vmatprep.subr.mxu1 %v762_v0 }
  0x4a   :  { %502 = vmatpush3.bf16.msra.mxu0 %v639_v16  ;;  %564 = vmatpush3.msra.mxu1 %v272_v28 }
  0x4b   :  { %503 = vmatprep.subr.bf16.mxu0 %v640_v18  ;;  %565 = vmatprep.subr.mxu1 %v762_v0 }
  0x4c   :  { %566 = vmatpush3.msra.mxu1 %v271_v29 }
  0x4d   :  { %567 = vmatprep.subr.mxu1 %v762_v0 }
  0x4e   :  { %504 = vmatpush3.bf16.msra.mxu0 %v641_v20  ;;  %568 = vmatpush3.msra.mxu1 %v270_v30 }
  0x4f   :  { %505 = vmatprep.subr.bf16.mxu0 %v642_v22  ;;  %569 = vmatprep.subr.mxu1 %v762_v0 }
  0x50   :  { %570 = vmatpush3.msra.mxu1 %v269_v31 }
  0x51   :  { %571 = vmatprep.subr.mxu1 %v762_v0 }
  0x52   :  { %506 = vmatpush3.bf16.msra.mxu0 %v643_v24  ;;  %572 = vmatpush3.msra.mxu1 %v268_v32 }
  0x53   :  { %582 = vmatprep.subr.mxu0 %v762_v0  ;;  %573 = vmatprep.subr.mxu1 %v762_v0 }
  0x54   :  { %574 = vmatpush3.msra.mxu1 %v267_v33 }
  0x55   :  { %257 = vmatmul.mubr.bf16.vlgmr.msra.gmra.mxu0 %v471_v27  ;;  %575 = vmatprep.subr.mxu1 %v762_v0 }
  0x56   :  { %576 = vmatpush3.msra.mxu1 %v266_v34  ;;  %614 = vmatprep.mubr.msk.f32.mxu0 %vm763_vm0, %v762_v0 }
  0x57   :  { %577 = vmatprep.subr.mxu1 %v762_v0  ;;  %583 = vmatpush3.msra.mxu0 %v374_v36 }
  0x58   :  { %578 = vmatpush3.msra.mxu1 %v265_v35  ;;  %584 = vmatprep.subr.mxu0 %v762_v0 }
  0x59   :  { %585 = vmatpush3.msra.mxu0 %v373_v37 }
  0x5a   :  { %586 = vmatprep.subr.mxu0 %v762_v0 }
  0x5b   :  { %587 = vmatpush3.msra.mxu0 %v372_v38 }
  0x5c   :  { %588 = vmatprep.subr.mxu0 %v762_v0 }
  0x5d   :  { %589 = vmatpush3.msra.mxu0 %v371_v39 }
  0x5e   :  { %590 = vmatprep.subr.mxu0 %v762_v0 }
  0x5f   :  { %591 = vmatpush3.msra.mxu0 %v370_v40 }
  0x60   :  { %592 = vmatprep.subr.mxu0 %v762_v0 }
  0x61   :  { %593 = vmatpush3.msra.mxu0 %v369_v41 }
  0x62   :  { %594 = vmatprep.subr.mxu0 %v762_v0 }
  0x63   :  { %595 = vmatpush3.msra.mxu0 %v368_v42 }
  0x64   :  { %596 = vmatprep.subr.mxu0 %v762_v0 }
  0x65   :  { %597 = vmatpush3.msra.mxu0 %v367_v43 }
  0x66   :  { %598 = vmatprep.subr.mxu0 %v762_v0 }
  0x67   :  { %599 = vmatpush3.msra.mxu0 %v366_v44 }
  0x68   :  { %600 = vmatprep.subr.mxu0 %v762_v0 }
  0x69   :  { %601 = vmatpush3.msra.mxu0 %v365_v45 }
  0x6a   :  { %602 = vmatprep.subr.mxu0 %v762_v0 }
  0x6b   :  { %603 = vmatpush3.msra.mxu0 %v364_v46 }
  0x6c   :  { %604 = vmatprep.subr.mxu0 %v762_v0 }
  0x6d   :  { %605 = vmatpush3.msra.mxu0 %v363_v47 }
  0x6e   :  { %606 = vmatprep.subr.mxu0 %v762_v0 }
  0x6f   :  { %607 = vmatpush3.msra.mxu0 %v362_v48 }
  0x70   :  { %608 = vmatprep.subr.mxu0 %v762_v0 }
  0x71   :  { %609 = vmatpush3.msra.mxu0 %v361_v57 }
  0x72   :  { %610 = vmatprep.subr.mxu0 %v762_v0 }
  0x73   :  { %611 = vmatpush3.msra.mxu0 %v360_v58 }
  0x74   :  { %612 = vmatprep.subr.mxu0 %v762_v0 }
  0x75   :  { %613 = vmatpush3.msra.mxu0 %v359_v59 }
 0x115   :  { %v507_v49 = vpop.f32.mrf.mxu0 }
 0x117   :  { %v508_v51 = vpop.f32.mrf.mxu0 }
 0x118   :  { %v509_v52 = vadd.f32 %v508_v51, %v507_v49 }
 0x119   :  { %v510_v53 = vpop.f32.mrf.mxu0 }
 0x11a   :  { %v259_v54 = vadd.f32 %v509_v52, %v470_v50 }
 0x11b   :  { %v511_v55 = vpop.f32.mrf.mxu0 }
 0x11c   :  { %v264_v56 = vmax.f32 %v259_v54, 0.0 }
 0x11e   :  { %580 = vmatmul.mubr.f32.vlgmr.msra.gmra.mxu1 %v264_v56 }
 0x1de   :  { %v354_v61 = vpop.f32.mrf.mxu1 }
 0x1df   :  { %v355_v62 = vadd.f32 %v489_v60, %v354_v61 }
 0x1e0   :  { %v581_v63 = vpop.f32.mrf.mxu1 }
 0x1e1   :  { %v358_v1 = vmax.f32 %v355_v62, 0.0 }
 0x1e3   :  { %615 = vmatmul.mubr.f32.vlgmr.msra.gmra.mxu0 %v358_v1 }
 0x2a3   :  { %v448_v3 = vpop.f32.mrf.mxu0 }
 0x2a4   :  { %v449_v4 = vadd.f32 %v490_v2, %v448_v3 }
 0x2a5   :  { %v616_v0 = vpop.f32.mrf.mxu0 }
 0x2a6   :  { %452 = vst [vmem:[#allocation10] sm:$0xff] %v449_v4 }
 0x2a7   :  { %737 = shalt.err (!%p734_p10)
}
 0x2a8   :  { %462 = dma.vmem_to_hbm [thread:$0]  %s460_s27, 128, %s870_s7, [#allocation4]  }
 0x2a9   :  { %752 = dma.done.wait [#allocation4], 128  }
 0x2aa   :  { %753 = vsyncadd [#allocation4], 4294967168 }
 0x2ab   :  { %466 = vsyncpa [#allocation3], 1 }
 0x2ac   :  { %467 = vsyncpa [#allocation6], 1 }
 0x2ad   :  { %468 = vsyncpa [#allocation9], 1 }
 0x2ae   :  { %469 = vsyncpa [#allocation4], 1 }

</bundles_post_ra>
